<compile_context>
chip_gen: v6e
topology: v6e:2x2x1
jax: 0.10.0
libtpu: 0.0.40
codegen_flags: <defaults>
</compile_context>

<pallas_src>
import jax
import jax.numpy as jnp
from jax.experimental import pallas as pl
from jax.experimental.pallas import tpu as pltpu

HIDDEN = 64
H2 = 2 * HIDDEN          # 128 = fused actor+critic width = one lane tile


def _round_up(n, m):
    return ((n + m - 1) // m) * m


# ----------------------------------------------------------------------------
# Kernel
# ----------------------------------------------------------------------------
def _make_kernel(s_dim, s_pad):
    """s_dim: true state_dim; s_pad: sublane-aligned state_dim (multiple of 8).
    Both baked in as static constants."""

    def kernel(x_ref, w_ref, b_ref, out_ref):
        cd = w_ref.dtype                                   # compute dtype (pre-packed)

        # layer 1: [tb, S] @ [S, 128]   (weight slice loaded right before use)
        x = x_ref[...].astype(cd)
        h = jnp.dot(x, w_ref[0:s_dim, :], preferred_element_type=jnp.float32)
        h = jnp.tanh(h + b_ref[0:1, :])

        # layer 2: block-diagonal [128, 128]
        h = jnp.dot(h.astype(cd), w_ref[s_pad:s_pad + H2, :],
                    preferred_element_type=jnp.float32)
        h = jnp.tanh(h + b_ref[1:2, :])

        # layer 3: block-diagonal [128, 128]; only cols 0 (logit), 1 (value) live
        out = jnp.dot(h.astype(cd), w_ref[s_pad + H2:s_pad + 2 * H2, :],
                      preferred_element_type=jnp.float32)
        out = out + b_ref[2:3, :]

        out_ref[...] = out[:, 0:2].astype(out_ref.dtype)

    return kernel


# ----------------------------------------------------------------------------
# One-time parameter preprocessing (hoisted out of the per-call path)
# ----------------------------------------------------------------------------
def pack_params(p, state_dim, dtype=jnp.float32):
    """Fuse actor+critic PyTorch-convention weights into one packed weight
    buffer [S8 + 256, 128] (cast to `dtype` = kernel compute dtype) and one
    f32 bias buffer [3, 128]."""
    S = state_dim
    S8 = _round_up(S, 8)
    H = HIDDEN

    w = jnp.zeros((S8 + 2 * H2, H2), jnp.float32)
    # layer 1: [S,128] = [a_w1.T | c_w1.T]   (rows S..S8-1 stay zero padding)
    w = w.at[0:S, 0:H].set(p["a_w1"].T)
    w = w.at[0:S, H:H2].set(p["c_w1"].T)
    # layer 2: block-diagonal [128,128] (off-diagonal blocks stay zero)
    w = w.at[S8:S8 + H, 0:H].set(p["a_w2"].T)
    w = w.at[S8 + H:S8 + H2, H:H2].set(p["c_w2"].T)
    # layer 3: block-diagonal padded to 128 lanes; col0 = actor, col1 = critic
    w = w.at[S8 + H2:S8 + H2 + H, 0:1].set(p["a_w3"].T)
    w = w.at[S8 + H2 + H:S8 + 2 * H2, 1:2].set(p["c_w3"].T)
    w = w.astype(dtype)                       # one-time cast; zero per-step work

    b = jnp.zeros((3, H2), jnp.float32)
    b = b.at[0, 0:H].set(p["a_b1"])
    b = b.at[0, H:H2].set(p["c_b1"])
    b = b.at[1, 0:H].set(p["a_b2"])
    b = b.at[1, H:H2].set(p["c_b2"])
    b = b.at[2, 0].set(p["a_b3"][0])
    b = b.at[2, 1].set(p["c_b3"][0])
    return w, b


def _choose_tile(batch, tile_b):
    """Batch tile: multiple of 8, as large as requested, but guaranteeing at
    least 2 grid steps when the batch allows it (v7x megacore sharding)."""
    cap = max(8, _round_up(pl.cdiv(batch, 2), 8))
    tb = max(8, min(_round_up(tile_b, 8), cap))
    return tb


# ----------------------------------------------------------------------------
# Forward wrapper
# ----------------------------------------------------------------------------
def ppo_forward(x, w_packed, b_packed, *, tile_b=1024, vmem_limit_bytes=None):
    """x: [B, state_dim] f32. Returns (logit [B,1], value [B]).
    Compute dtype = w_packed.dtype (use pack_params(..., dtype=jnp.bfloat16)
    for the MXU-bound regime). Wrap in jax.jit for production rollout loops."""
    B, S = x.shape
    S8 = w_packed.shape[0] - 2 * H2
    assert S <= S8 < S + 8, "packed weights do not match state_dim"

    tb = _choose_tile(B, tile_b)
    grid = (pl.cdiv(B, tb),)     # partial last block: no wrapper-side x padding

    w_bytes = w_packed.size * w_packed.dtype.itemsize
    cost = pl.CostEstimate(
        flops=2 * B * (S + 2 * H2) * H2,
        transcendentals=2 * B * H2,
        bytes_accessed=x.size * x.dtype.itemsize + w_bytes
        + b_packed.size * 4 + B * 2 * 4,
    )

    out = pl.pallas_call(
        _make_kernel(S, S8),
        out_shape=jax.ShapeDtypeStruct((B, 2), jnp.float32),
        grid=grid,
        in_specs=[
            pl.BlockSpec((tb, S), lambda i: (i, 0)),             # x batch tile
            pl.BlockSpec((S8 + 2 * H2, H2), lambda i: (0, 0)),   # weights (resident)
            pl.BlockSpec((3, H2), lambda i: (0, 0)),             # biases  (resident)
        ],
        out_specs=pl.BlockSpec((tb, 2), lambda i: (i, 0)),
        compiler_params=pltpu.CompilerParams(
            dimension_semantics=("parallel",),                   # 2 TCs on v7x
            vmem_limit_bytes=vmem_limit_bytes),
        cost_estimate=cost,
    )(x, w_packed, b_packed)

    return out[:, 0:1], out[:, 1]


# ----------------------------------------------------------------------------
# Synthetic init + pure-JAX reference (mirrors the PyTorch module)
# ----------------------------------------------------------------------------
def init_params(key, state_dim, hidden=HIDDEN):
    keys = jax.random.split(key, 12)

    def lin(kw, kb, fan_in, fan_out):
        bound = 1.0 / jnp.sqrt(fan_in)
        w = jax.random.uniform(kw, (fan_out, fan_in), jnp.float32, -bound, bound)
        b = jax.random.uniform(kb, (fan_out,), jnp.float32, -bound, bound)
        return w, b

    a_w1, a_b1 = lin(keys[0], keys[1], state_dim, hidden)
    a_w2, a_b2 = lin(keys[2], keys[3], hidden, hidden)
    a_w3, a_b3 = lin(keys[4], keys[5], hidden, 1)
    c_w1, c_b1 = lin(keys[6], keys[7], state_dim, hidden)
    c_w2, c_b2 = lin(keys[8], keys[9], hidden, hidden)
    c_w3, c_b3 = lin(keys[10], keys[11], hidden, 1)
    return {
        "a_w1": a_w1, "a_b1": a_b1, "a_w2": a_w2, "a_b2": a_b2,
        "a_w3": a_w3, "a_b3": a_b3,
        "c_w1": c_w1, "c_b1": c_b1, "c_w2": c_w2, "c_b2": c_b2,
        "c_w3": c_w3, "c_b3": c_b3,
    }


def ppo_forward_ref(x, p):
    def mlp(x, w1, b1, w2, b2, w3, b3):
        h = jnp.tanh(x @ w1.T + b1)
        h = jnp.tanh(h @ w2.T + b2)
        return h @ w3.T + b3
    logit = mlp(x, p["a_w1"], p["a_b1"], p["a_w2"], p["a_b2"], p["a_w3"], p["a_b3"])
    value = mlp(x, p["c_w1"], p["c_b1"], p["c_w2"], p["c_b2"], p["c_w3"], p["c_b3"])
    return logit, value[:, 0]


if __name__ == "__main__":
    batch, state_dim = 8, 32
    key = jax.random.PRNGKey(0)
    kx, kp = jax.random.split(key)

    x = jax.random.normal(kx, (batch, state_dim), jnp.float32)
    params = init_params(kp, state_dim)

    # f32 path (exact match with reference)
    w_packed, b_packed = pack_params(params, state_dim)        # one-time packing
    logit, value = ppo_forward(x, w_packed, b_packed)
    logit, value = jax.block_until_ready((logit, value))

    logit_ref, value_ref = ppo_forward_ref(x, params)
    assert logit.shape == (batch, 1)
    assert value.shape == (batch,)
    assert jnp.allclose(logit, logit_ref, atol=1e-5, rtol=1e-5)
    assert jnp.allclose(value, value_ref, atol=1e-5, rtol=1e-5)

    # Multi-tile grid + ragged batch (partial last block, no wrapper-side pad).
    x2 = jax.random.normal(jax.random.PRNGKey(1), (20, state_dim), jnp.float32)
    l2, v2 = ppo_forward(x2, w_packed, b_packed, tile_b=8)
    l2, v2 = jax.block_until_ready((l2, v2))
    l2r, v2r = ppo_forward_ref(x2, params)
    assert jnp.allclose(l2, l2r, atol=1e-5, rtol=1e-5)
    assert jnp.allclose(v2, v2r, atol=1e-5, rtol=1e-5)

    # Opt-in bf16 compute path (pre-packed bf16 weights -> no per-step astype).
    w_bf16, b_bf16 = pack_params(params, state_dim, dtype=jnp.bfloat16)
    l3, v3 = ppo_forward(x, w_bf16, b_bf16)
    l3, v3 = jax.block_until_ready((l3, v3))
    assert jnp.allclose(l3, logit_ref, atol=2e-2, rtol=2e-2)
    assert jnp.allclose(v3, value_ref, atol=2e-2, rtol=2e-2)

    print("KERNEL_OK")
</pallas_src>

<mosaic_0001>
module attributes {stable_mosaic.version = 11 : i64} {
  func.func @kernel(%arg0: i32, %arg1: memref<8x32xf32, #tpu.memory_space<vmem>>, %arg2: memref<288x128xf32, #tpu.memory_space<vmem>>, %arg3: memref<3x128xf32, #tpu.memory_space<vmem>>, %arg4: memref<8x2xf32, #tpu.memory_space<vmem>>) attributes {dimension_semantics = [#tpu.dimension_semantics<parallel>], iteration_bounds = array<i64: 1>, scalar_prefetch = 0 : i64, scratch_operands = 0 : i64, tpu.core_type = #tpu.core_type<tc>, window_params = [{transform_indices = @transform_0, window_bounds = array<i64: 8, 32>}, {pipeline_mode = #tpu.pipeline_mode<synchronous>, transform_indices = @transform_1, window_bounds = array<i64: 288, 128>}, {pipeline_mode = #tpu.pipeline_mode<synchronous>, transform_indices = @transform_2, window_bounds = array<i64: 3, 128>}, {transform_indices = @transform_3, window_bounds = array<i64: 8, 2>}]} {
    %c0 = arith.constant 0 : index
    %c0_0 = arith.constant 0 : index
    %0 = vector.load %arg1[%c0, %c0_0] : memref<8x32xf32, #tpu.memory_space<vmem>>, vector<8x32xf32>
    %c0_1 = arith.constant 0 : index
    %c0_2 = arith.constant 0 : index
    %1 = vector.load %arg2[%c0_1, %c0_2] : memref<288x128xf32, #tpu.memory_space<vmem>>, vector<32x128xf32>
    %cst = arith.constant dense<0.000000e+00> : vector<8x128xf32>
    %2 = tpu.matmul %0, %1, %cst {dimension_numbers = #tpu.dot_dimension_numbers<[1], [0], [0], [1], [0, 0, 1, 1], [], []>} : vector<8x32xf32>, vector<32x128xf32>, vector<8x128xf32> -> vector<8x128xf32>
    %c0_3 = arith.constant 0 : index
    %c0_4 = arith.constant 0 : index
    %3 = vector.load %arg3[%c0_3, %c0_4] : memref<3x128xf32, #tpu.memory_space<vmem>>, vector<1x128xf32>
    %4 = vector.broadcast %3 : vector<1x128xf32> to vector<8x128xf32>
    %5 = arith.addf %2, %4 : vector<8x128xf32>
    %6 = math.tanh %5 : vector<8x128xf32>
    %c32 = arith.constant 32 : index
    %c0_5 = arith.constant 0 : index
    %7 = vector.load %arg2[%c32, %c0_5] : memref<288x128xf32, #tpu.memory_space<vmem>>, vector<128x128xf32>
    %cst_6 = arith.constant dense<0.000000e+00> : vector<8x128xf32>
    %8 = tpu.matmul %6, %7, %cst_6 {dimension_numbers = #tpu.dot_dimension_numbers<[1], [0], [0], [1], [0, 0, 1, 1], [], []>} : vector<8x128xf32>, vector<128x128xf32>, vector<8x128xf32> -> vector<8x128xf32>
    %c1 = arith.constant 1 : index
    %c0_7 = arith.constant 0 : index
    %9 = vector.load %arg3[%c1, %c0_7] : memref<3x128xf32, #tpu.memory_space<vmem>>, vector<1x128xf32>
    %10 = vector.broadcast %9 : vector<1x128xf32> to vector<8x128xf32>
    %11 = arith.addf %8, %10 : vector<8x128xf32>
    %12 = math.tanh %11 : vector<8x128xf32>
    %c160 = arith.constant 160 : index
    %c0_8 = arith.constant 0 : index
    %13 = vector.load %arg2[%c160, %c0_8] : memref<288x128xf32, #tpu.memory_space<vmem>>, vector<128x128xf32>
    %cst_9 = arith.constant dense<0.000000e+00> : vector<8x128xf32>
    %14 = tpu.matmul %12, %13, %cst_9 {dimension_numbers = #tpu.dot_dimension_numbers<[1], [0], [0], [1], [0, 0, 1, 1], [], []>} : vector<8x128xf32>, vector<128x128xf32>, vector<8x128xf32> -> vector<8x128xf32>
    %c2 = arith.constant 2 : index
    %c0_10 = arith.constant 0 : index
    %15 = vector.load %arg3[%c2, %c0_10] : memref<3x128xf32, #tpu.memory_space<vmem>>, vector<1x128xf32>
    %16 = vector.broadcast %15 : vector<1x128xf32> to vector<8x128xf32>
    %17 = arith.addf %14, %16 : vector<8x128xf32>
    %18 = vector.extract_strided_slice %17 {offsets = [0, 0], sizes = [8, 2], strides = [1, 1]} : vector<8x128xf32> to vector<8x2xf32>
    %c0_11 = arith.constant 0 : index
    %c0_12 = arith.constant 0 : index
    %19 = vector.load %arg4[%c0_11, %c0_12] : memref<8x2xf32, #tpu.memory_space<vmem>>, vector<8x2xf32>
    tpu.vector_store %arg4[%c0_11, %c0_12], %18 {strides = array<i32>} : memref<8x2xf32, #tpu.memory_space<vmem>>, vector<8x2xf32>,
    return
  }
  func.func @transform_0(%arg0: i32) -> (i32, i32) {
    %c0_i32 = arith.constant 0 : i32
    %c0_i32_0 = arith.constant 0 : i32
    return %arg0, %c0_i32 : i32, i32
  }
  func.func @transform_1(%arg0: i32) -> (i32, i32) {
    %c0_i32 = arith.constant 0 : i32
    %c0_i32_0 = arith.constant 0 : i32
    %c0_i32_1 = arith.constant 0 : i32
    return %c0_i32, %c0_i32_0 : i32, i32
  }
  func.func @transform_2(%arg0: i32) -> (i32, i32) {
    %c0_i32 = arith.constant 0 : i32
    %c0_i32_0 = arith.constant 0 : i32
    %c0_i32_1 = arith.constant 0 : i32
    return %c0_i32, %c0_i32_0 : i32, i32
  }
  func.func @transform_3(%arg0: i32) -> (i32, i32) {
    %c0_i32 = arith.constant 0 : i32
    %c0_i32_0 = arith.constant 0 : i32
    return %arg0, %c0_i32 : i32, i32
  }
}

</mosaic_0001>

<bundles_post_ra>
// kernel: tpu_custom_call.1
= control target key start
LH: loop header
LB: loop body
LE: loop exit
PB: predicated region body
PF: predicated region fallthrough
CT: control target
= control target key end

     0   :  { %8 = vsyncpa [#allocation3], 0  ;;  %s607_s0 = inlined_call_operand.hbm [shape: f32[8,32], index: 0, kind: input, shape index: {}]   ;;  %s608_s1 = inlined_call_operand.hbm [shape: f32[288,128], index: 1, kind: input, shape index: {}]   ;;  %s609_s2 = inlined_call_operand.hbm [shape: f32[3,128], index: 2, kind: input, shape index: {}]   ;;  %s610_s3 = inlined_call_operand.vmem [shape: f32[8,2], index: 3, kind: output, shape index: {}]  }
   0x1   :  { %9 = vsyncpa [#allocation5], 0  ;;  %s526_s12 = smov [#allocation4]  }
   0x2   :  { %s25_s13 = sshll.u32 %s526_s12, 4  ;;  %s26_s13 = int_to_ptr.vmem [resolvable:$true] %s25_s13 }
   0x3   :  { %s470_s14 = scalar_lea.vmem %s26_s13, 4608  ;;  %p475_p1 = scmp.lt.s32.totalorder %s26_s13, %s26_s13 }
   0x4   :  { %p471_p0 = scmp.ne.s32.totalorder %s26_s13, %s470_s14  ;;  %p476_p2 = scmp.lt.s32.totalorder %s470_s14, %s470_s14 }
   0x6   :  { %p477_p3 = por %p476_p2, %p475_p1 }
   0x8   :  { %p478_p4 = pnand %p477_p3, %p471_p0 }
   0xa   :  { %481 = shalt.err (!%p478_p4)
}
   0xb   :  { %s527_s15 = smov 128   ;;  %s528_s16 = smov 8  }
   0xc   :  { %31 = dma.hbm_to_vmem [thread:$0]  %s608_s1, 4608, %s26_s13, [#allocation5], %s527_s15, %s527_s15, %s528_s16  }
   0xd   :  { %s529_s19 = smov [#allocation2]   ;;  %s530_s21 = smov [#allocation6]  }
   0xe   :  { %s16_s20 = sshll.u32 %s529_s19, 4  ;;  %s38_s22 = sshll.u32 %s530_s21, 4  ;;  %s17_s20 = int_to_ptr.vmem [resolvable:$true] %s16_s20  ;;  %s39_s22 = int_to_ptr.vmem [resolvable:$true] %s38_s22 }
   0xf   :  { %s490_s23 = scalar_lea.vmem %s17_s20, 128  ;;  %p495_p6 = scmp.lt.s32.totalorder %s17_s20, %s17_s20 }
  0x10   :  { %p491_p5 = scmp.ne.s32.totalorder %s17_s20, %s490_s23  ;;  %p496_p7 = scmp.lt.s32.totalorder %s490_s23, %s490_s23 }
  0x12   :  { %p497_p8 = por %p496_p7, %p495_p6 }
  0x14   :  { %p498_p9 = pnand %p497_p8, %p491_p5 }
  0x16   :  { %501 = shalt.err (!%p498_p9)
}
  0x17   :  { %19 = dma.hbm_to_vmem [thread:$0]  %s607_s0, 128, %s17_s20, [#allocation3]  }
  0x18   :  { %s510_s26 = scalar_lea.vmem %s39_s22, 64  ;;  %p515_p11 = scmp.lt.s32.totalorder %s39_s22, %s39_s22 }
  0x19   :  { %p511_p10 = scmp.ne.s32.totalorder %s39_s22, %s510_s26  ;;  %p516_p12 = scmp.lt.s32.totalorder %s510_s26, %s510_s26 }
  0x1b   :  { %p517_p13 = por %p516_p12, %p515_p11 }
  0x1d   :  { %p518_p0 = pnand %p517_p13, %p511_p10 }
  0x1f   :  { %521 = shalt.err (!%p518_p0)
}
  0x20   :  { %41 = dma.hbm_to_vmem [thread:$0]  %s609_s2, 64, %s39_s22, [#allocation5]  }
  0x21   :  { %522 = dma.done.wait [#allocation3], 128  }
  0x22   :  { %523 = vsyncadd [#allocation3], 4294967168 }
  0x23   :  { %524 = dma.done.wait [#allocation5], 4672  }
  0x24   :  { %525 = vsyncadd [#allocation5], 4294962624  ;;  %v531_v0 = vmov 0.0   ;;  %vm532_vm0 = vmmov 0   ;;  %v55_v1 = vld [vmem:[#allocation4 + $0x18] sm:$0xff]  ;;  %v54_v2 = vld [vmem:[#allocation4 + $0x10] sm:$0xff] }
  0x25   :  { %370 = vmatprep.subr.mxu0 %v531_v0  ;;  %378 = vmatprep.mubr.msk.f32.mxu0 %vm532_vm0, %v531_v0  ;;  %v151_v3 = vld [vmem:[#allocation4 + $0x98] sm:$0xff]  ;;  %v53_v4 = vld [vmem:[#allocation4 + $0x8] sm:$0xff]  ;;  %v150_v5 = vld [vmem:[#allocation4 + $0x90] sm:$0xff]  ;;  %vm61_vm1 = vcmask 261120   ;;  %vm319_vm2 = vcmask 15360  }
  0x26   :  { %381 = vmatprep.subr.mxu1 %v531_v0  ;;  %413 = vmatprep.mubr.msk.f32.mxu1 %vm532_vm0, %v531_v0  ;;  %v149_v6 = vld [vmem:[#allocation4 + $0x88] sm:$0xff]  ;;  %v52_v7 = vld [vmem:[#allocation4] sm:$0xff]  ;;  %v51_v8 = vld [vmem:[#allocation2] sm:$0xff] }
  0x27   :  { %371 = vmatpush3.msra.mxu0 %v55_v1  ;;  %382 = vmatpush3.msra.mxu1 %v151_v3  ;;  %v148_v9 = vld [vmem:[#allocation4 + $0x80] sm:$0xff]  ;;  %v147_v10 = vld [vmem:[#allocation4 + $0x78] sm:$0xff]  ;;  %v146_v11 = vld [vmem:[#allocation4 + $0x70] sm:$0xff] }
  0x28   :  { %372 = vmatprep.subr.mxu0 %v531_v0  ;;  %383 = vmatprep.subr.mxu1 %v531_v0  ;;  %v145_v12 = vld [vmem:[#allocation4 + $0x68] sm:$0xff]  ;;  %v144_v13 = vld [vmem:[#allocation4 + $0x60] sm:$0xff]  ;;  %v143_v14 = vld [vmem:[#allocation4 + $0x58] sm:$0xff] }
  0x29   :  { %373 = vmatpush3.msra.mxu0 %v54_v2  ;;  %384 = vmatpush3.msra.mxu1 %v150_v5  ;;  %v142_v15 = vld [vmem:[#allocation4 + $0x50] sm:$0xff]  ;;  %v141_v16 = vld [vmem:[#allocation4 + $0x48] sm:$0xff]  ;;  %v140_v17 = vld [vmem:[#allocation4 + $0x40] sm:$0xff] }
  0x2a   :  { %374 = vmatprep.subr.mxu0 %v531_v0  ;;  %385 = vmatprep.subr.mxu1 %v531_v0  ;;  %v139_v18 = vld [vmem:[#allocation4 + $0x38] sm:$0xff]  ;;  %v138_v19 = vld [vmem:[#allocation4 + $0x30] sm:$0xff]  ;;  %v137_v20 = vld [vmem:[#allocation4 + $0x28] sm:$0xff] }
  0x2b   :  { %375 = vmatpush3.msra.mxu0 %v53_v4  ;;  %386 = vmatpush3.msra.mxu1 %v149_v6  ;;  %v136_v21 = vld [vmem:[#allocation4 + $0x20] sm:$0xff]  ;;  %v243_v22 = vld [vmem:[#allocation4 + $0x118] sm:$0xff]  ;;  %v242_v23 = vld [vmem:[#allocation4 + $0x110] sm:$0xff] }
  0x2c   :  { %376 = vmatprep.subr.mxu0 %v531_v0  ;;  %387 = vmatprep.subr.mxu1 %v531_v0  ;;  %v241_v24 = vld [vmem:[#allocation4 + $0x108] sm:$0xff]  ;;  %v240_v25 = vld [vmem:[#allocation4 + $0x100] sm:$0xff]  ;;  %v239_v26 = vld [vmem:[#allocation4 + $0xf8] sm:$0xff] }
  0x2d   :  { %377 = vmatpush3.msra.mxu0 %v52_v7  ;;  %388 = vmatpush3.msra.mxu1 %v148_v9  ;;  %v238_v27 = vld [vmem:[#allocation4 + $0xf0] sm:$0xff]  ;;  %v237_v28 = vld [vmem:[#allocation4 + $0xe8] sm:$0xff]  ;;  %v327_v29 = vld [vmem:[#allocation6] ss:$0 sm:$0xff] }
  0x2e   :  { %379 = vmatmul.mubr.msk.f32.vlgmr.msra.gmra.mxu0 %vm61_vm1, %v51_v8  ;;  %389 = vmatprep.subr.mxu1 %v531_v0  ;;  %v236_v34 = vld [vmem:[#allocation4 + $0xe0] sm:$0xff]  ;;  %v235_v35 = vld [vmem:[#allocation4 + $0xd8] sm:$0xff]  ;;  %v234_v36 = vld [vmem:[#allocation4 + $0xd0] sm:$0xff] }
  0x2f   :  { %416 = vmatprep.subr.mxu0 %v531_v0  ;;  %390 = vmatpush3.msra.mxu1 %v147_v10  ;;  %v233_v37 = vld [vmem:[#allocation4 + $0xc8] sm:$0xff]  ;;  %v232_v38 = vld [vmem:[#allocation4 + $0xc0] sm:$0xff]  ;;  %v231_v39 = vld [vmem:[#allocation4 + $0xb8] sm:$0xff] }
  0x30   :  { %448 = vmatprep.mubr.msk.f32.mxu0 %vm532_vm0, %v531_v0  ;;  %391 = vmatprep.subr.mxu1 %v531_v0  ;;  %v230_v40 = vld [vmem:[#allocation4 + $0xb0] sm:$0xff]  ;;  %v229_v41 = vld [vmem:[#allocation4 + $0xa8] sm:$0xff]  ;;  %v228_v42 = vld [vmem:[#allocation4 + $0xa0] sm:$0xff] }
  0x31   :  { %392 = vmatpush3.msra.mxu1 %v146_v11  ;;  %417 = vmatpush3.msra.mxu0 %v243_v22  ;;  %v329_v43 = vld [vmem:[#allocation6 + $0x1] ss:$0 sm:$0xff]  ;;  %v330_v48 = vld [vmem:[#allocation6 + $0x2] ss:$0 sm:$0xff] }
  0x32   :  { %393 = vmatprep.subr.mxu1 %v531_v0  ;;  %418 = vmatprep.subr.mxu0 %v531_v0 }
  0x33   :  { %394 = vmatpush3.msra.mxu1 %v145_v12  ;;  %419 = vmatpush3.msra.mxu0 %v242_v23 }
  0x34   :  { %395 = vmatprep.subr.mxu1 %v531_v0  ;;  %420 = vmatprep.subr.mxu0 %v531_v0 }
  0x35   :  { %396 = vmatpush3.msra.mxu1 %v144_v13  ;;  %421 = vmatpush3.msra.mxu0 %v241_v24 }
  0x36   :  { %397 = vmatprep.subr.mxu1 %v531_v0  ;;  %422 = vmatprep.subr.mxu0 %v531_v0 }
  0x37   :  { %398 = vmatpush3.msra.mxu1 %v143_v14  ;;  %423 = vmatpush3.msra.mxu0 %v240_v25 }
  0x38   :  { %399 = vmatprep.subr.mxu1 %v531_v0  ;;  %424 = vmatprep.subr.mxu0 %v531_v0 }
  0x39   :  { %400 = vmatpush3.msra.mxu1 %v142_v15  ;;  %425 = vmatpush3.msra.mxu0 %v239_v26 }
  0x3a   :  { %401 = vmatprep.subr.mxu1 %v531_v0  ;;  %426 = vmatprep.subr.mxu0 %v531_v0 }
  0x3b   :  { %402 = vmatpush3.msra.mxu1 %v141_v16  ;;  %427 = vmatpush3.msra.mxu0 %v238_v27 }
  0x3c   :  { %403 = vmatprep.subr.mxu1 %v531_v0  ;;  %428 = vmatprep.subr.mxu0 %v531_v0 }
  0x3d   :  { %404 = vmatpush3.msra.mxu1 %v140_v17  ;;  %429 = vmatpush3.msra.mxu0 %v237_v28 }
  0x3e   :  { %405 = vmatprep.subr.mxu1 %v531_v0  ;;  %430 = vmatprep.subr.mxu0 %v531_v0 }
  0x3f   :  { %406 = vmatpush3.msra.mxu1 %v139_v18  ;;  %431 = vmatpush3.msra.mxu0 %v236_v34 }
  0x40   :  { %407 = vmatprep.subr.mxu1 %v531_v0  ;;  %432 = vmatprep.subr.mxu0 %v531_v0 }
  0x41   :  { %408 = vmatpush3.msra.mxu1 %v138_v19  ;;  %433 = vmatpush3.msra.mxu0 %v235_v35 }
  0x42   :  { %409 = vmatprep.subr.mxu1 %v531_v0  ;;  %434 = vmatprep.subr.mxu0 %v531_v0 }
  0x43   :  { %410 = vmatpush3.msra.mxu1 %v137_v20  ;;  %435 = vmatpush3.msra.mxu0 %v234_v36 }
  0x44   :  { %411 = vmatprep.subr.mxu1 %v531_v0  ;;  %436 = vmatprep.subr.mxu0 %v531_v0 }
  0x45   :  { %412 = vmatpush3.msra.mxu1 %v136_v21  ;;  %437 = vmatpush3.msra.mxu0 %v233_v37 }
  0x46   :  { %438 = vmatprep.subr.mxu0 %v531_v0 }
  0x47   :  { %439 = vmatpush3.msra.mxu0 %v232_v38 }
  0x48   :  { %440 = vmatprep.subr.mxu0 %v531_v0 }
  0x49   :  { %441 = vmatpush3.msra.mxu0 %v231_v39 }
  0x4a   :  { %442 = vmatprep.subr.mxu0 %v531_v0 }
  0x4b   :  { %443 = vmatpush3.msra.mxu0 %v230_v40 }
  0x4c   :  { %444 = vmatprep.subr.mxu0 %v531_v0 }
  0x4d   :  { %445 = vmatpush3.msra.mxu0 %v229_v41 }
  0x4e   :  { %446 = vmatprep.subr.mxu0 %v531_v0 }
  0x4f   :  { %447 = vmatpush3.msra.mxu0 %v228_v42 }
  0xee   :  { %v131_v30 = vpop.f32.mrf.mxu0 }
  0xef   :  { %v132_v31 = vadd.f32 %v327_v29, %v131_v30 }
  0xf0   :  { %v380_v32 = vpop.f32.mrf.mxu0 }
  0xf1   :  { %458 = vtanh.f32 %v132_v31 }
  0xfe   :  { %v459_v33 = vpop.eup %458 }
  0xff   :  { %414 = vmatmul.mubr.f32.vlgmr.msra.gmra.mxu1 %v459_v33 }
 0x1bf   :  { %v223_v44 = vpop.f32.mrf.mxu1 }
 0x1c0   :  { %v224_v45 = vadd.f32 %v329_v43, %v223_v44 }
 0x1c1   :  { %v415_v46 = vpop.f32.mrf.mxu1 }
 0x1c2   :  { %460 = vtanh.f32 %v224_v45 }
 0x1cf   :  { %v461_v47 = vpop.eup %460 }
 0x1d0   :  { %449 = vmatmul.mubr.f32.vlgmr.msra.gmra.mxu0 %v461_v47 }
 0x290   :  { %v315_v49 = vpop.f32.mrf.mxu0 }
 0x291   :  { %v316_v50 = vadd.f32 %v330_v48, %v315_v49 }
 0x292   :  { %v450_v51 = vpop.f32.mrf.mxu0 }
 0x293   :  { %320 = vst.msk [vmem:[%s610_s3] sm:$0xff] %vm319_vm2, %v316_v50 }
 0x294   :  { %325 = vsyncpa [#allocation3], 1 }
 0x295   :  { %326 = vsyncpa [#allocation5], 1 }

</bundles_post_ra>
